<compile_context>
chip_gen: v6e
topology: v6e:2x2x1
jax: 0.10.0
libtpu: 0.0.40
codegen_flags: <defaults>
</compile_context>

<pallas_src>
import jax
import jax.numpy as jnp
import numpy as np
from jax import lax
from jax.experimental import pallas as pl
from jax.experimental.pallas import tpu as pltpu


# ----------------------------------------------------------------------------
# helpers: tile / chunk sizes that respect the (8,128) block rules
# ----------------------------------------------------------------------------
def _row_tile(m, max_tile=512):
    """Largest tile <= max_tile that divides m and is a multiple of 8, else full m."""
    if m % 8 != 0:
        return m
    tm = min(max_tile, m)
    while m % tm:
        tm -= 8
    return max(tm, 8)


def _vocab_tile(v, max_tile=512):
    """Vocab (lane) tile: multiple of 128 dividing v, else full v."""
    if v % 128 != 0:
        return v
    tv = min(max_tile, v)
    while v % tv:
        tv -= 128
    return max(tv, 128)


def _seq_chunk(n, max_chunk=32):
    """Time/decode chunk size; multiple of 8 when possible."""
    if n % 8 != 0:
        return n
    c = min(max_chunk, n)
    while n % c:
        c -= 8
    return max(c, 8)


def _batch_split(b):
    """Leading 'parallel' grid factor (2 TensorCores on v7x) when B allows it."""
    return 2 if (b % 16 == 0) else 1


def _nbytes(shape, dtype):
    n = 1
    for s in shape:
        n *= int(s)
    return n * np.dtype(dtype).itemsize


def _mosaic_params(semantics, block_bytes):
    """CompilerParams with an explicit VMEM limit sized from block footprints."""
    limit = int(block_bytes * 1.5) + (4 << 20)
    limit = min(100 << 20, max(32 << 20, limit))
    return pltpu.CompilerParams(dimension_semantics=semantics,
                                vmem_limit_bytes=limit)


# ----------------------------------------------------------------------------
# Hoisted input projection (batched over all steps, grid "parallel")
# ----------------------------------------------------------------------------
def _dense_kernel(x_ref, w_ref, b_ref, o_ref):
    o_ref[...] = (jnp.dot(x_ref[...], w_ref[...],
                          preferred_element_type=jnp.float32)
                  + b_ref[...]).astype(o_ref.dtype)


def dense(x, w, b, out_dtype=jnp.float32):
    """(M,K) @ (K,N) + b -> (M,N); x/w bf16, accumulate f32."""
    m, k = x.shape
    _, n = w.shape
    tm = _row_tile(m)
    vmem = (2 * _nbytes((tm, k), x.dtype)
            + _nbytes((k, n), w.dtype)            # Buffered(1)
            + _nbytes((1, n), jnp.float32)        # Buffered(1)
            + 2 * _nbytes((tm, n), out_dtype))
    return pl.pallas_call(
        _dense_kernel,
        out_shape=jax.ShapeDtypeStruct((m, n), out_dtype),
        grid_spec=pltpu.PrefetchScalarGridSpec(
            num_scalar_prefetch=0,
            grid=(m // tm,),
            in_specs=[
                pl.BlockSpec((tm, k), lambda i: (i, 0)),
                pl.BlockSpec((k, n), lambda i: (0, 0),
                             pipeline_mode=pl.Buffered(1)),
                pl.BlockSpec((1, n), lambda i: (0, 0),
                             pipeline_mode=pl.Buffered(1)),
            ],
            out_specs=pl.BlockSpec((tm, n), lambda i: (i, 0)),
        ),
        compiler_params=_mosaic_params(("parallel",), vmem),
    )(x, w, b)


# ----------------------------------------------------------------------------
# Hoisted output projection + log_softmax, tiled over the vocab dimension.
# Pass A: online logsumexp over V tiles.  Pass B: recompute logits, normalize.
# ----------------------------------------------------------------------------
def _vocab_stats_kernel(x_ref, w_ref, b_ref, lse_ref, m_sc, l_sc):
    j = pl.program_id(1)

    @pl.when(j == 0)
    def _():
        m_sc[...] = jnp.full_like(m_sc, -jnp.inf)
        l_sc[...] = jnp.zeros_like(l_sc)

    logits = (jnp.dot(x_ref[...], w_ref[...],
                      preferred_element_type=jnp.float32) + b_ref[...])
    m_new = jnp.maximum(m_sc[...], jnp.max(logits, axis=-1, keepdims=True))
    l_sc[...] = (l_sc[...] * jnp.exp(m_sc[...] - m_new)
                 + jnp.sum(jnp.exp(logits - m_new), axis=-1, keepdims=True))
    m_sc[...] = m_new

    @pl.when(j == pl.num_programs(1) - 1)
    def _():
        lse_ref[...] = m_sc[...] + jnp.log(l_sc[...])


def _vocab_norm_kernel(x_ref, w_ref, b_ref, lse_ref, o_ref):
    logits = (jnp.dot(x_ref[...], w_ref[...],
                      preferred_element_type=jnp.float32) + b_ref[...])
    o_ref[...] = (logits - lse_ref[...]).astype(o_ref.dtype)


def proj_logsoftmax(x, w, b):
    m, k = x.shape
    _, v = w.shape
    tm = _row_tile(m)
    tv = _vocab_tile(v)
    nv = v // tv

    vmem_a = (2 * _nbytes((tm, k), x.dtype) + 2 * _nbytes((k, tv), w.dtype)
              + 2 * _nbytes((1, tv), jnp.float32)
              + 2 * _nbytes((tm, 1), jnp.float32)
              + 2 * _nbytes((tm, 1), jnp.float32))
    lse = pl.pallas_call(
        _vocab_stats_kernel,
        out_shape=jax.ShapeDtypeStruct((m, 1), jnp.float32),
        grid_spec=pltpu.PrefetchScalarGridSpec(
            num_scalar_prefetch=0,
            grid=(m // tm, nv),
            in_specs=[
                pl.BlockSpec((tm, k), lambda i, j: (i, 0)),
                pl.BlockSpec((k, tv), lambda i, j: (0, j)),
                pl.BlockSpec((1, tv), lambda i, j: (0, j)),
            ],
            out_specs=pl.BlockSpec((tm, 1), lambda i, j: (i, 0)),
            scratch_shapes=[pltpu.VMEM((tm, 1), jnp.float32),
                            pltpu.VMEM((tm, 1), jnp.float32)],
        ),
        compiler_params=_mosaic_params(("parallel", "arbitrary"), vmem_a),
    )(x, w, b)

    vmem_b = (2 * _nbytes((tm, k), x.dtype) + 2 * _nbytes((k, tv), w.dtype)
              + 2 * _nbytes((1, tv), jnp.float32)
              + 2 * _nbytes((tm, 1), jnp.float32)
              + 2 * _nbytes((tm, tv), jnp.float32))
    return pl.pallas_call(
        _vocab_norm_kernel,
        out_shape=jax.ShapeDtypeStruct((m, v), jnp.float32),
        grid_spec=pltpu.PrefetchScalarGridSpec(
            num_scalar_prefetch=0,
            grid=(m // tm, nv),
            in_specs=[
                pl.BlockSpec((tm, k), lambda i, j: (i, 0)),
                pl.BlockSpec((k, tv), lambda i, j: (0, j)),
                pl.BlockSpec((1, tv), lambda i, j: (0, j)),
                pl.BlockSpec((tm, 1), lambda i, j: (i, 0)),
            ],
            out_specs=pl.BlockSpec((tm, tv), lambda i, j: (i, j)),
        ),
        compiler_params=_mosaic_params(("parallel", "parallel"), vmem_b),
    )(x, w, b, lse)


# ----------------------------------------------------------------------------
# Listener: GRU recurrence over (batch-split, time-chunk) grid
# ----------------------------------------------------------------------------
def _listener_recurrent_kernel(gi_ref, w_hh_ref, b_hh_ref,
                               enc_ref, hfin_ref, h_scratch):
    c = pl.program_id(1)
    tc = gi_ref.shape[0]
    bp, hdim = h_scratch.shape

    @pl.when(c == 0)
    def _():
        h_scratch[...] = jnp.zeros_like(h_scratch)

    w_hh = w_hh_ref[...]                                      # (H,3H) bf16, resident
    b_hh = pl.broadcast_to(b_hh_ref[...], (bp, 3 * hdim))     # hoisted broadcast

    def step(t, h):
        gi = gi_ref[t].astype(jnp.float32)                    # (Bp,3H) precomputed
        gh = jnp.dot(h.astype(jnp.bfloat16), w_hh,
                     preferred_element_type=jnp.float32) + b_hh
        r = jax.nn.sigmoid(gi[:, 0:hdim] + gh[:, 0:hdim])
        z = jax.nn.sigmoid(gi[:, hdim:2 * hdim] + gh[:, hdim:2 * hdim])
        n = jnp.tanh(gi[:, 2 * hdim:3 * hdim] + r * gh[:, 2 * hdim:3 * hdim])
        h_new = (1.0 - z) * n + z * h
        enc_ref[t] = h_new.astype(enc_ref.dtype)
        return h_new

    h_last = lax.fori_loop(0, tc, step, h_scratch[...], unroll=4)
    h_scratch[...] = h_last

    @pl.when(c == pl.num_programs(1) - 1)
    def _():
        hfin_ref[...] = h_last


def listener_forward(feats, p):
    B, T, F = feats.shape
    H = p["w_hh"].shape[0]

    # Hoisted input projection: one (T*B, F) x (F, 3H) MXU matmul for all steps,
    # written back in bf16 (halves the recurrence's streamed-input DMA).
    feats_tm = jnp.transpose(feats, (1, 0, 2)).reshape(T * B, F)
    gi = dense(feats_tm.astype(jnp.bfloat16), p["w_ih"], p["b_ih"],
               out_dtype=jnp.bfloat16)
    gi = gi.reshape(T, B, 3 * H)                               # time-major

    Tc = _seq_chunk(T)
    nb = _batch_split(B)
    Bp = B // nb

    vmem = (2 * _nbytes((Tc, Bp, 3 * H), jnp.bfloat16)
            + _nbytes((H, 3 * H), jnp.bfloat16)
            + _nbytes((1, 3 * H), jnp.float32)
            + 2 * _nbytes((Tc, Bp, H), jnp.bfloat16)
            + 2 * _nbytes((Bp, H), jnp.float32)
            + _nbytes((Bp, H), jnp.float32))

    enc_tm, h_final = pl.pallas_call(
        _listener_recurrent_kernel,
        out_shape=(jax.ShapeDtypeStruct((T, B, H), jnp.bfloat16),
                   jax.ShapeDtypeStruct((B, H), jnp.float32)),
        grid_spec=pltpu.PrefetchScalarGridSpec(
            num_scalar_prefetch=0,
            grid=(nb, T // Tc),
            in_specs=[
                pl.BlockSpec((Tc, Bp, 3 * H), lambda b, c: (c, b, 0)),
                pl.BlockSpec((H, 3 * H), lambda b, c: (0, 0),
                             pipeline_mode=pl.Buffered(1)),
                pl.BlockSpec((1, 3 * H), lambda b, c: (0, 0),
                             pipeline_mode=pl.Buffered(1)),
            ],
            out_specs=[
                pl.BlockSpec((Tc, Bp, H), lambda b, c: (c, b, 0)),
                pl.BlockSpec((Bp, H), lambda b, c: (b, 0)),
            ],
            scratch_shapes=[pltpu.VMEM((Bp, H), jnp.float32)],
        ),
        compiler_params=_mosaic_params(("parallel", "arbitrary"), vmem),
    )(gi, p["w_hh"], p["b_hh"])
    return enc_tm, h_final


# ----------------------------------------------------------------------------
# Speller: GRU + MXU attention per decode step; emits [h ; ctx] per step
# ----------------------------------------------------------------------------
def _speller_recurrent_kernel(gi_ref, enc_ref, h0_ref, w_hh_ref, b_hh_ref,
                              hc_ref, h_scratch):
    c = pl.program_id(1)
    lc = gi_ref.shape[0]
    bp, hdim = h_scratch.shape

    @pl.when(c == 0)
    def _():
        h_scratch[...] = h0_ref[...]

    w_hh = w_hh_ref[...]                                      # (H,3H) bf16
    b_hh = pl.broadcast_to(b_hh_ref[...], (bp, 3 * hdim))     # hoisted broadcast

    def step(l, h):
        gi = gi_ref[l].astype(jnp.float32)                    # (Bp,3H) precomputed
        gh = jnp.dot(h.astype(jnp.bfloat16), w_hh,
                     preferred_element_type=jnp.float32) + b_hh
        r = jax.nn.sigmoid(gi[:, 0:hdim] + gh[:, 0:hdim])
        z = jax.nn.sigmoid(gi[:, hdim:2 * hdim] + gh[:, hdim:2 * hdim])
        n = jnp.tanh(gi[:, 2 * hdim:3 * hdim] + r * gh[:, 2 * hdim:3 * hdim])
        h_new = (1.0 - z) * n + z * h

        # Dot-product attention on the MXU; enc read per step from the ref so a
        # (B,T,H) value is not kept live across the whole unrolled loop.
        enc = enc_ref[...]                                    # (Bp,T,H) bf16
        q = h_new[:, None, :].astype(jnp.bfloat16)            # (Bp,1,H)
        scores = jnp.einsum('bqh,bth->bqt', q, enc,
                            preferred_element_type=jnp.float32)[:, 0, :]
        scores = scores - jnp.max(scores, axis=-1, keepdims=True)
        w = jnp.exp(scores)
        attn = w / jnp.sum(w, axis=-1, keepdims=True)         # exact softmax
        a = attn[:, None, :].astype(jnp.bfloat16)             # (Bp,1,T)
        ctx = jnp.einsum('bqt,bth->bqh', a, enc,
                         preferred_element_type=jnp.float32)[:, 0, :]

        # Two direct stores instead of a per-step concatenate temp.
        hc_ref[l, :, 0:hdim] = h_new.astype(hc_ref.dtype)
        hc_ref[l, :, hdim:2 * hdim] = ctx.astype(hc_ref.dtype)
        return h_new

    h_last = lax.fori_loop(0, lc, step, h_scratch[...], unroll=4)
    h_scratch[...] = h_last


def speller_forward(targets, enc_tm, listener_hidden, p):
    T, B, H = enc_tm.shape
    L = targets.shape[1]
    E = p["embedding"].shape[1]
    V = p["w_o"].shape[1]

    # Embedding lookup (glue) + hoisted input projection over all decode steps.
    emb = jnp.take(p["embedding"], jnp.transpose(targets), axis=0)   # (L,B,E) bf16
    gi = dense(emb.reshape(L * B, E), p["w_ih"], p["b_ih"],
               out_dtype=jnp.bfloat16)
    gi = gi.reshape(L, B, 3 * H)

    # Batch-major view of encoder outputs for the attention matmuls.
    enc_bm = jnp.transpose(enc_tm, (1, 0, 2))                        # (B,T,H) bf16

    Lc = _seq_chunk(L)
    nb = _batch_split(B)
    Bp = B // nb

    vmem = (2 * _nbytes((Lc, Bp, 3 * H), jnp.bfloat16)
            + _nbytes((Bp, T, H), jnp.bfloat16)       # enc, Buffered(1)
            + _nbytes((Bp, H), jnp.float32)           # h0,  Buffered(1)
            + _nbytes((H, 3 * H), jnp.bfloat16)       # w_hh, Buffered(1)
            + _nbytes((1, 3 * H), jnp.float32)        # b_hh, Buffered(1)
            + 2 * _nbytes((Lc, Bp, 2 * H), jnp.bfloat16)
            + _nbytes((Bp, H), jnp.float32))

    hc = pl.pallas_call(
        _speller_recurrent_kernel,
        out_shape=jax.ShapeDtypeStruct((L, B, 2 * H), jnp.bfloat16),
        grid_spec=pltpu.PrefetchScalarGridSpec(
            num_scalar_prefetch=0,
            grid=(nb, L // Lc),
            in_specs=[
                pl.BlockSpec((Lc, Bp, 3 * H), lambda b, c: (c, b, 0)),
                pl.BlockSpec((Bp, T, H), lambda b, c: (b, 0, 0),
                             pipeline_mode=pl.Buffered(1)),
                pl.BlockSpec((Bp, H), lambda b, c: (b, 0),
                             pipeline_mode=pl.Buffered(1)),
                pl.BlockSpec((H, 3 * H), lambda b, c: (0, 0),
                             pipeline_mode=pl.Buffered(1)),
                pl.BlockSpec((1, 3 * H), lambda b, c: (0, 0),
                             pipeline_mode=pl.Buffered(1)),
            ],
            out_specs=pl.BlockSpec((Lc, Bp, 2 * H), lambda b, c: (c, b, 0)),
            scratch_shapes=[pltpu.VMEM((Bp, H), jnp.float32)],
        ),
        compiler_params=_mosaic_params(("parallel", "arbitrary"), vmem),
    )(gi, enc_bm, listener_hidden, p["w_hh"], p["b_hh"])

    # Hoisted, V-tiled output projection + log_softmax over all L*B rows.
    logit_flat = proj_logsoftmax(hc.reshape(L * B, 2 * H), p["w_o"], p["b_o"])
    logit = jnp.transpose(logit_flat.reshape(L, B, V), (1, 0, 2))    # (B,L,V)
    y_hat = jnp.argmax(logit, axis=-1)
    return y_hat, logit


# ----------------------------------------------------------------------------
# ListenAttendSpell.forward equivalent
# ----------------------------------------------------------------------------
def listen_attend_spell_forward(feats, targets, params):
    listener_outputs, listener_hidden = listener_forward(feats, params["listener"])
    y_hat, logit = speller_forward(targets, listener_outputs, listener_hidden,
                                   params["speller"])
    return y_hat, logit


# ----------------------------------------------------------------------------
# Deterministic parameter construction
# ----------------------------------------------------------------------------
def init_params(key, feat_size, hidden, vocab, embed):
    ks = jax.random.split(key, 12)

    def u(k, shape, scale, dtype=jnp.float32):
        return jax.random.uniform(k, shape, jnp.float32, -scale, scale).astype(dtype)

    s_h = 1.0 / float(hidden) ** 0.5
    listener = dict(
        w_ih=u(ks[0], (feat_size, 3 * hidden), s_h, jnp.bfloat16),
        w_hh=u(ks[1], (hidden, 3 * hidden), s_h, jnp.bfloat16),
        b_ih=u(ks[2], (1, 3 * hidden), s_h),
        b_hh=u(ks[3], (1, 3 * hidden), s_h),
    )
    # W_oh / W_oc pre-concatenated so the [h ; ctx] projection is one matmul.
    w_oh = u(ks[9], (hidden, vocab), s_h)
    w_oc = u(ks[10], (hidden, vocab), s_h)
    speller = dict(
        embedding=u(ks[4], (vocab, embed), 1.0, jnp.bfloat16),
        w_ih=u(ks[5], (embed, 3 * hidden), s_h, jnp.bfloat16),
        w_hh=u(ks[6], (hidden, 3 * hidden), s_h, jnp.bfloat16),
        b_ih=u(ks[7], (1, 3 * hidden), s_h),
        b_hh=u(ks[8], (1, 3 * hidden), s_h),
        w_o=jnp.concatenate([w_oh, w_oc], axis=0).astype(jnp.bfloat16),
        b_o=u(ks[11], (1, vocab), s_h),
    )
    return dict(listener=listener, speller=speller)


if __name__ == "__main__":
    # Small, lane-friendly config (H, 2H, 3H multiples of 128; B multiple of 16 so
    # the batch-parallel grid axis and the V-tiled log-softmax are both exercised).
    B, T, F = 16, 16, 64          # batch, encoder time steps, feature dim
    H, V, E, L = 128, 1024, 64, 8  # hidden, vocab, embed dim, decode steps

    key = jax.random.PRNGKey(0)
    k_feat, k_tgt, k_par = jax.random.split(key, 3)
    feats = jax.random.normal(k_feat, (B, T, F), jnp.float32)
    targets = jax.random.randint(k_tgt, (B, L), 0, V, jnp.int32)
    params = init_params(k_par, F, H, V, E)

    y_hat, logit = listen_attend_spell_forward(feats, targets, params)
    jax.block_until_ready((y_hat, logit))

    assert y_hat.shape == (B, L)
    assert logit.shape == (B, L, V)
    assert bool(jnp.isfinite(logit).all())
    # log_softmax rows must sum to ~1 in prob space
    assert bool(jnp.allclose(jnp.sum(jnp.exp(logit), axis=-1), 1.0, atol=1e-4))
    print("KERNEL_OK")
</pallas_src>

<mosaic_0001>
module attributes {stable_mosaic.version = 11 : i64} {
  func.func @_dense_kernel(%arg0: i32, %arg1: memref<256x64xbf16, #tpu.memory_space<vmem>>, %arg2: memref<64x384xbf16, #tpu.memory_space<vmem>>, %arg3: memref<1x384xf32, #tpu.memory_space<vmem>>, %arg4: memref<256x384xbf16, #tpu.memory_space<vmem>>) attributes {dimension_semantics = [#tpu.dimension_semantics<parallel>], iteration_bounds = array<i64: 1>, scalar_prefetch = 0 : i64, scratch_operands = 0 : i64, tpu.core_type = #tpu.core_type<tc>, window_params = [{transform_indices = @transform_0, window_bounds = array<i64: 256, 64>}, {pipeline_mode = #tpu.pipeline_mode<synchronous>, transform_indices = @transform_1, window_bounds = array<i64: 64, 384>}, {pipeline_mode = #tpu.pipeline_mode<synchronous>, transform_indices = @transform_2, window_bounds = array<i64: 1, 384>}, {transform_indices = @transform_3, window_bounds = array<i64: 256, 384>}]} {
    %c0 = arith.constant 0 : index
    %c0_0 = arith.constant 0 : index
    %0 = vector.load %arg1[%c0, %c0_0] : memref<256x64xbf16, #tpu.memory_space<vmem>>, vector<256x64xbf16>
    %c0_1 = arith.constant 0 : index
    %c0_2 = arith.constant 0 : index
    %1 = vector.load %arg2[%c0_1, %c0_2] : memref<64x384xbf16, #tpu.memory_space<vmem>>, vector<64x384xbf16>
    %cst = arith.constant dense<0.000000e+00> : vector<256x384xf32>
    %2 = tpu.matmul %0, %1, %cst {dimension_numbers = #tpu.dot_dimension_numbers<[1], [0], [0], [1], [0, 0, 1, 1], [], []>} : vector<256x64xbf16>, vector<64x384xbf16>, vector<256x384xf32> -> vector<256x384xf32>
    %c0_3 = arith.constant 0 : index
    %c0_4 = arith.constant 0 : index
    %3 = vector.load %arg3[%c0_3, %c0_4] : memref<1x384xf32, #tpu.memory_space<vmem>>, vector<1x384xf32>
    %4 = vector.broadcast %3 : vector<1x384xf32> to vector<256x384xf32>
    %5 = arith.addf %2, %4 : vector<256x384xf32>
    %6 = arith.truncf %5 : vector<256x384xf32> to vector<256x384xbf16>
    %c0_5 = arith.constant 0 : index
    %c0_6 = arith.constant 0 : index
    %7 = vector.load %arg4[%c0_5, %c0_6] : memref<256x384xbf16, #tpu.memory_space<vmem>>, vector<256x384xbf16>
    tpu.vector_store %arg4[%c0_5, %c0_6], %6 {strides = array<i32>} : memref<256x384xbf16, #tpu.memory_space<vmem>>, vector<256x384xbf16>,
    return
  }
  func.func @transform_0(%arg0: i32) -> (i32, i32) {
    %c0_i32 = arith.constant 0 : i32
    %c0_i32_0 = arith.constant 0 : i32
    return %arg0, %c0_i32 : i32, i32
  }
  func.func @transform_1(%arg0: i32) -> (i32, i32) {
    %c0_i32 = arith.constant 0 : i32
    %c0_i32_0 = arith.constant 0 : i32
    %c0_i32_1 = arith.constant 0 : i32
    return %c0_i32, %c0_i32_0 : i32, i32
  }
  func.func @transform_2(%arg0: i32) -> (i32, i32) {
    %c0_i32 = arith.constant 0 : i32
    %c0_i32_0 = arith.constant 0 : i32
    %c0_i32_1 = arith.constant 0 : i32
    return %c0_i32, %c0_i32_0 : i32, i32
  }
  func.func @transform_3(%arg0: i32) -> (i32, i32) {
    %c0_i32 = arith.constant 0 : i32
    %c0_i32_0 = arith.constant 0 : i32
    return %arg0, %c0_i32 : i32, i32
  }
}

</mosaic_0001>

<bundles_post_ra>
// kernel: tpu_custom_call.1
= control target key start
LH: loop header
LB: loop body
LE: loop exit
PB: predicated region body
PF: predicated region fallthrough
CT: control target
= control target key end

     0   :  { %v1342_v2 = vmov 0   ;;  %vm225_vm0 = vcmask 523264   ;;  %s1620_s0 = inlined_call_operand.vmem [shape: bf16[256,64], index: 0, kind: input, shape index: {}]   ;;  %s1621_s1 = inlined_call_operand.vmem [shape: bf16[64,384], index: 1, kind: input, shape index: {}]   ;;  %s1622_s2 = inlined_call_operand.vmem [shape: f32[1,384], index: 2, kind: input, shape index: {}]   ;;  %s1623_s3 = inlined_call_operand.hbm [shape: bf16[256,384], index: 3, kind: output, shape index: {}]  }
   0x1   :  { %v1288_v0 = vld [vmem:[%s1621_s1 + $0x4c] ss:$12 sps:$4 sm:$0xff]   ;;  %v1290_v1 = vld [vmem:[%s1621_s1 + $0x48] ss:$12 sps:$4 sm:$0xff]   ;;  %306 = vmatprep.mubr.bf16.mxu0 %v1342_v2  ;;  %426 = vmatprep.mubr.bf16.mxu1 %v1342_v2  ;;  %v1293_v4 = vld [vmem:[%s1621_s1 + $0x30] ss:$12 sps:$4 sm:$0xff]  }
   0x2   :  { %282 = vmatprep.subr.bf16.mxu0 %v1288_v0  ;;  %1276 = vmatprep.subr.bf16.mxu1 %v1288_v0  ;;  %v1291_v3 = vld [vmem:[%s1621_s1 + $0x34] ss:$12 sps:$4 sm:$0xff]   ;;  %v1294_v5 = vld [vmem:[%s1621_s1 + $0x1c] ss:$12 sps:$4 sm:$0xff]   ;;  %v1296_v6 = vld [vmem:[%s1621_s1 + $0x18] ss:$12 sps:$4 sm:$0xff]  }
   0x3   :  { %283 = vmatpush1.bf16.msra.mxu0 %v1290_v1  ;;  %1280 = vmatpush1.bf16.msra.mxu1 %v1290_v1  ;;  %v1297_v7 = vld [vmem:[%s1621_s1 + $0x4] ss:$12 sps:$4 sm:$0xff]   ;;  %v1299_v8 = vld [vmem:[%s1621_s1] ss:$12 sps:$4 sm:$0xff]   ;;  %v1311_v16 = vld [vmem:[%s1621_s1 + $0x8] ss:$12 sps:$4 sm:$0xff]  }
   0x4   :  { %284 = vmatprep.subr.bf16.mxu0 %v1291_v3  ;;  %1277 = vmatprep.subr.bf16.mxu1 %v1291_v3  ;;  %v1302_v9 = vld [vmem:[%s1621_s1 + $0x50] ss:$12 sps:$4 sm:$0xff]   ;;  %v1300_v10 = vld [vmem:[%s1620_s0] sm:$0xff]   ;;  %v1303_v14 = vld [vmem:[%s1620_s0 + $0x8] sm:$0xff]  }
   0x5   :  { %v1401_v11 = vld [vmem:[%s1620_s0 + $0x60] sm:$0xff]   ;;  %v1304_v15 = vld [vmem:[%s1620_s0 + $0x68] sm:$0xff]  }
   0x6   :  { %v1305_v12 = vld [vmem:[%s1621_s1 + $0x38] ss:$12 sps:$4 sm:$0xff]   ;;  %v1308_v13 = vld [vmem:[%s1621_s1 + $0x20] ss:$12 sps:$4 sm:$0xff]  }
   0x7   :  { %285 = vmatpush1.bf16.msra.mxu0 %v1293_v4  ;;  %1281 = vmatpush1.bf16.msra.mxu1 %v1293_v4 }
   0x8   :  { %286 = vmatprep.subr.bf16.mxu0 %v1294_v5  ;;  %1278 = vmatprep.subr.bf16.mxu1 %v1294_v5 }
   0xb   :  { %287 = vmatpush1.bf16.msra.mxu0 %v1296_v6  ;;  %1282 = vmatpush1.bf16.msra.mxu1 %v1296_v6 }
   0xc   :  { %288 = vmatprep.subr.bf16.mxu0 %v1297_v7  ;;  %1279 = vmatprep.subr.bf16.mxu1 %v1297_v7 }
   0xf   :  { %289 = vmatpush1.bf16.msra.mxu0 %v1299_v8  ;;  %1283 = vmatpush1.bf16.msra.mxu1 %v1299_v8 }
  0x10   :  { %1236 = vmatprep.subr.bf16.mxu1 %v1302_v9 }
  0x12   :  { %1056 = vmatmul.mubr.msk.bf16.vlgmr.msra.gmra.mxu0 %vm225_vm0, %v1300_v10  ;;  %1068 = vmatmul.mubr.msk.bf16.vlgmr.msra.gmra.mxu1 %vm225_vm0, %v1401_v11 }
  0x13   :  { %1237 = vmatpush3.bf16.msra.mxu1 %v1302_v9  ;;  %316 = vmatprep.mubr.bf16.mxu0 %v1342_v2 }
  0x14   :  { %436 = vmatprep.mubr.bf16.mxu1 %v1342_v2  ;;  %1238 = vmatprep.subr.bf16.mxu1 %v1305_v12 }
  0x17   :  { %1239 = vmatpush3.bf16.msra.mxu1 %v1305_v12 }
  0x18   :  { %1240 = vmatprep.subr.bf16.mxu1 %v1308_v13 }
  0x19   :  { %8 = vsyncpa [#allocation3], 0  ;;  %v1306_v17 = vld [vmem:[%s1620_s0 + $0x10] sm:$0xff]   ;;  %v1309_v19 = vld [vmem:[%s1620_s0 + $0x18] sm:$0xff]   ;;  %v66_v29 = vlaneseq }
  0x1a   :  { %1057 = vmatmul.mubr.msk.bf16.gmra.mxu0 %vm225_vm0, %v1303_v14  ;;  %1069 = vmatmul.mubr.msk.bf16.gmra.mxu1 %vm225_vm0, %v1304_v15  ;;  %v1307_v18 = vld [vmem:[%s1620_s0 + $0x70] sm:$0xff]   ;;  %v1310_v20 = vld [vmem:[%s1620_s0 + $0x78] sm:$0xff]   ;;  %v1312_v21 = vld [vmem:[%s1620_s0 + $0x20] sm:$0xff]  }
  0x1b   :  { %326 = vmatprep.mubr.bf16.mxu0 %v1342_v2  ;;  %446 = vmatprep.mubr.bf16.mxu1 %v1342_v2  ;;  %v1313_v22 = vld [vmem:[%s1620_s0 + $0x28] sm:$0xff]   ;;  %v1314_v23 = vld [vmem:[%s1620_s0 + $0x30] sm:$0xff]   ;;  %v1315_v24 = vld [vmem:[%s1620_s0 + $0x38] sm:$0xff]   ;;  %v1502_v30 = vshrl.u32 %v66_v29, 7 }
  0x1c   :  { %1241 = vmatpush3.bf16.msra.mxu1 %v1308_v13  ;;  %v1316_v25 = vld [vmem:[%s1620_s0 + $0x40] sm:$0xff]   ;;  %v1317_v26 = vld [vmem:[%s1620_s0 + $0x48] sm:$0xff]   ;;  %v1318_v27 = vld [vmem:[%s1620_s0 + $0x50] sm:$0xff]  }
  0x1d   :  { %1242 = vmatprep.subr.bf16.mxu1 %v1311_v16  ;;  %v1319_v28 = vld [vmem:[%s1620_s0 + $0x58] sm:$0xff]   ;;  %v68_v31 = vsub.s32 0, %v1502_v30  ;;  %v72_v32 = vsub.s32 1, %v1502_v30  ;;  %v1509_v33 = vld [vmem:[%s1622_s2] sm:$0x7]  ;;  %s1343_s2 = smov [#allocation2]  }
  0x1e   :  { %s1017_s14 = sshll.u32 %s1343_s2, 4  ;;  %s1018_s14 = int_to_ptr.vmem [resolvable:$true] %s1017_s14 }
  0x1f   :  { %v1512_v34 = vrot.slane %v1509_v33, %v68_v31  ;;  %v1515_v35 = vrot.slane %v1509_v33, %v72_v32  ;;  %s1320_s15 = scalar_lea.vmem %s1018_s14, 6144  ;;  %p1325_p1 = scmp.lt.s32.totalorder %s1018_s14, %s1018_s14 }
  0x20   :  { %1243 = vmatpush3.bf16.msra.mxu1 %v1311_v16  ;;  %p1321_p0 = scmp.ne.s32.totalorder %s1018_s14, %s1320_s15  ;;  %p1326_p2 = scmp.lt.s32.totalorder %s1320_s15, %s1320_s15 }
  0x22   :  { %1058 = vmatmul.mubr.msk.bf16.gmra.mxu0 %vm225_vm0, %v1306_v17  ;;  %1070 = vmatmul.mubr.msk.bf16.gmra.mxu1 %vm225_vm0, %v1307_v18  ;;  %p1327_p3 = por %p1326_p2, %p1325_p1 }
  0x23   :  { %336 = vmatprep.mubr.bf16.mxu0 %v1342_v2  ;;  %456 = vmatprep.mubr.bf16.mxu1 %v1342_v2 }
  0x24   :  { %p1328_p4 = pnand %p1327_p3, %p1321_p0 }
  0x2a   :  { %1059 = vmatmul.mubr.msk.bf16.gmra.mxu0 %vm225_vm0, %v1309_v19  ;;  %1071 = vmatmul.mubr.msk.bf16.gmra.mxu1 %vm225_vm0, %v1310_v20 }
  0x2b   :  { %346 = vmatprep.mubr.bf16.mxu0 %v1342_v2  ;;  %1244 = vmatprep.mubr.msk.bf16.mxu1 %vm225_vm0, %v1300_v10 }
  0x32   :  { %1060 = vmatmul.mubr.msk.bf16.gmra.mxu0 %vm225_vm0, %v1312_v21  ;;  %1245 = vmatmul.mubr.msk.bf16.vlgmr.msra.gmra.mxu1 %vm225_vm0, %v1303_v14 }
  0x33   :  { %356 = vmatprep.mubr.bf16.mxu0 %v1342_v2  ;;  %1248 = vmatprep.mubr.msk.bf16.mxu1 %vm225_vm0, %v1306_v17 }
  0x3a   :  { %1061 = vmatmul.mubr.msk.bf16.gmra.mxu0 %vm225_vm0, %v1313_v22  ;;  %1249 = vmatmul.mubr.msk.bf16.gmra.mxu1 %vm225_vm0, %v1309_v19 }
  0x3b   :  { %366 = vmatprep.mubr.bf16.mxu0 %v1342_v2  ;;  %1252 = vmatprep.mubr.msk.bf16.mxu1 %vm225_vm0, %v1312_v21 }
  0x42   :  { %1062 = vmatmul.mubr.msk.bf16.gmra.mxu0 %vm225_vm0, %v1314_v23  ;;  %1253 = vmatmul.mubr.msk.bf16.gmra.mxu1 %vm225_vm0, %v1313_v22 }
  0x43   :  { %376 = vmatprep.mubr.bf16.mxu0 %v1342_v2  ;;  %1256 = vmatprep.mubr.msk.bf16.mxu1 %vm225_vm0, %v1314_v23 }
  0x4a   :  { %1063 = vmatmul.mubr.msk.bf16.gmra.mxu0 %vm225_vm0, %v1315_v24  ;;  %1257 = vmatmul.mubr.msk.bf16.gmra.mxu1 %vm225_vm0, %v1315_v24 }
  0x4b   :  { %386 = vmatprep.mubr.bf16.mxu0 %v1342_v2  ;;  %1260 = vmatprep.mubr.msk.bf16.mxu1 %vm225_vm0, %v1316_v25 }
  0x52   :  { %1064 = vmatmul.mubr.msk.bf16.gmra.mxu0 %vm225_vm0, %v1316_v25  ;;  %1261 = vmatmul.mubr.msk.bf16.gmra.mxu1 %vm225_vm0, %v1317_v26 }
  0x53   :  { %396 = vmatprep.mubr.bf16.mxu0 %v1342_v2  ;;  %1264 = vmatprep.mubr.msk.bf16.mxu1 %vm225_vm0, %v1318_v27 }
  0x5a   :  { %1065 = vmatmul.mubr.msk.bf16.gmra.mxu0 %vm225_vm0, %v1317_v26  ;;  %1265 = vmatmul.mubr.msk.bf16.gmra.mxu1 %vm225_vm0, %v1319_v28 }
  0x5b   :  { %406 = vmatprep.mubr.bf16.mxu0 %v1342_v2  ;;  %1268 = vmatprep.mubr.msk.bf16.mxu1 %vm225_vm0, %v1401_v11 }
  0x62   :  { %1066 = vmatmul.mubr.msk.bf16.gmra.mxu0 %vm225_vm0, %v1318_v27  ;;  %1269 = vmatmul.mubr.msk.bf16.gmra.mxu1 %vm225_vm0, %v1304_v15 }
  0x63   :  { %416 = vmatprep.mubr.bf16.mxu0 %v1342_v2  ;;  %1272 = vmatprep.mubr.msk.bf16.mxu1 %vm225_vm0, %v1307_v18 }
  0x6a   :  { %1067 = vmatmul.mubr.msk.bf16.gmra.mxu0 %vm225_vm0, %v1319_v28  ;;  %1273 = vmatmul.mubr.msk.bf16.gmra.mxu1 %vm225_vm0, %v1310_v20 }
  0xd2   :  { %v308_v36 = vpop.f32.mrf.mxu0  ;;  %v428_v37 = vpop.f32.mrf.mxu1 }
  0xd3   :  { %v309_v40 = vadd.f32 %v308_v36, %v1512_v34  ;;  %v429_v41 = vadd.f32 %v428_v37, %v1512_v34 }
  0xd4   :  { %v310_v38 = vpop.f32.mrf.mxu0  ;;  %v430_v39 = vpop.f32.mrf.mxu1 }
  0xd5   :  { %v311_v42 = vadd.f32 %v310_v38, %v1515_v35  ;;  %v431_v43 = vadd.f32 %v430_v39, %v1515_v35  ;;  %v76_v38 = vsub.s32 2, %v1502_v30 }
  0xd6   :  { %v312_v44 = vpop.f32.mrf.mxu0  ;;  %v432_v45 = vpop.f32.mrf.mxu1 }
  0xd7   :  { %v1152_v46 = vpack.c.bf16 %v311_v42, %v309_v40  ;;  %v1200_v47 = vpack.c.bf16 %v431_v43, %v429_v41  ;;  %v313_v50 = vadd.f32 %v312_v44, %v1512_v34  ;;  %v433_v51 = vadd.f32 %v432_v45, %v1512_v34 }
  0xd8   :  { %v314_v48 = vpop.f32.mrf.mxu0  ;;  %v434_v49 = vpop.f32.mrf.mxu1 }
  0xd9   :  { %948 = vst [vmem:[#allocation2] sm:$0xff] %v1152_v46  ;;  %996 = vst [vmem:[#allocation2 + $0x120] sm:$0xff] %v1200_v47  ;;  %v315_v52 = vadd.f32 %v314_v48, %v1515_v35  ;;  %v435_v53 = vadd.f32 %v434_v49, %v1515_v35  ;;  %v1547_v49 = vrot.slane %v1509_v33, %v76_v38 }
  0xda   :  { %v318_v54 = vpop.f32.mrf.mxu0  ;;  %v438_v55 = vpop.f32.mrf.mxu1 }
  0xdb   :  { %v1154_v56 = vpack.c.bf16 %v315_v52, %v313_v50  ;;  %v1202_v57 = vpack.c.bf16 %v435_v53, %v433_v51  ;;  %v319_v60 = vadd.f32 %v318_v54, %v1512_v34  ;;  %v439_v61 = vadd.f32 %v438_v55, %v1512_v34 }
  0xdc   :  { %v320_v58 = vpop.f32.mrf.mxu0  ;;  %v440_v59 = vpop.f32.mrf.mxu1 }
  0xdd   :  { %950 = vst [vmem:[#allocation2 + $0xc] sm:$0xff] %v1154_v56  ;;  %998 = vst [vmem:[#allocation2 + $0x12c] sm:$0xff] %v1202_v57  ;;  %v321_v62 = vadd.f32 %v320_v58, %v1515_v35  ;;  %v441_v63 = vadd.f32 %v440_v59, %v1515_v35 }
  0xde   :  { %v322_v0 = vpop.f32.mrf.mxu0  ;;  %v442_v1 = vpop.f32.mrf.mxu1 }
  0xdf   :  { %v1156_v2 = vpack.c.bf16 %v321_v62, %v319_v60  ;;  %v1204_v3 = vpack.c.bf16 %v441_v63, %v439_v61  ;;  %v323_v6 = vadd.f32 %v322_v0, %v1512_v34  ;;  %v443_v7 = vadd.f32 %v442_v1, %v1512_v34 }
  0xe0   :  { %v324_v4 = vpop.f32.mrf.mxu0  ;;  %v444_v5 = vpop.f32.mrf.mxu1 }
  0xe1   :  { %952 = vst [vmem:[#allocation2 + $0x18] sm:$0xff] %v1156_v2  ;;  %1000 = vst [vmem:[#allocation2 + $0x138] sm:$0xff] %v1204_v3  ;;  %v325_v8 = vadd.f32 %v324_v4, %v1515_v35  ;;  %v445_v9 = vadd.f32 %v444_v5, %v1515_v35 }
  0xe2   :  { %v328_v10 = vpop.f32.mrf.mxu0  ;;  %v448_v11 = vpop.f32.mrf.mxu1 }
  0xe3   :  { %v1158_v12 = vpack.c.bf16 %v325_v8, %v323_v6  ;;  %v1206_v13 = vpack.c.bf16 %v445_v9, %v443_v7  ;;  %v329_v16 = vadd.f32 %v328_v10, %v1512_v34  ;;  %v449_v17 = vadd.f32 %v448_v11, %v1512_v34 }
  0xe4   :  { %v330_v14 = vpop.f32.mrf.mxu0  ;;  %v450_v15 = vpop.f32.mrf.mxu1 }
  0xe5   :  { %954 = vst [vmem:[#allocation2 + $0x24] sm:$0xff] %v1158_v12  ;;  %1002 = vst [vmem:[#allocation2 + $0x144] sm:$0xff] %v1206_v13  ;;  %v331_v18 = vadd.f32 %v330_v14, %v1515_v35  ;;  %v451_v19 = vadd.f32 %v450_v15, %v1515_v35 }
  0xe6   :  { %v332_v20 = vpop.f32.mrf.mxu0  ;;  %v452_v21 = vpop.f32.mrf.mxu1 }
  0xe7   :  { %v1160_v22 = vpack.c.bf16 %v331_v18, %v329_v16  ;;  %v1208_v23 = vpack.c.bf16 %v451_v19, %v449_v17  ;;  %v333_v26 = vadd.f32 %v332_v20, %v1512_v34  ;;  %v453_v27 = vadd.f32 %v452_v21, %v1512_v34 }
  0xe8   :  { %v334_v24 = vpop.f32.mrf.mxu0  ;;  %v454_v25 = vpop.f32.mrf.mxu1 }
  0xe9   :  { %956 = vst [vmem:[#allocation2 + $0x30] sm:$0xff] %v1160_v22  ;;  %1004 = vst [vmem:[#allocation2 + $0x150] sm:$0xff] %v1208_v23  ;;  %v335_v28 = vadd.f32 %v334_v24, %v1515_v35  ;;  %v455_v29 = vadd.f32 %v454_v25, %v1515_v35 }
  0xea   :  { %v338_v31 = vpop.f32.mrf.mxu0  ;;  %v458_v32 = vpop.f32.mrf.mxu1 }
  0xeb   :  { %v1162_v36 = vpack.c.bf16 %v335_v28, %v333_v26  ;;  %v1210_v37 = vpack.c.bf16 %v455_v29, %v453_v27  ;;  %v339_v41 = vadd.f32 %v338_v31, %v1512_v34  ;;  %v459_v42 = vadd.f32 %v458_v32, %v1512_v34 }
  0xec   :  { %v340_v39 = vpop.f32.mrf.mxu0  ;;  %v460_v40 = vpop.f32.mrf.mxu1 }
  0xed   :  { %958 = vst [vmem:[#allocation2 + $0x3c] sm:$0xff] %v1162_v36  ;;  %1006 = vst [vmem:[#allocation2 + $0x15c] sm:$0xff] %v1210_v37  ;;  %v341_v43 = vadd.f32 %v340_v39, %v1515_v35  ;;  %v461_v44 = vadd.f32 %v460_v40, %v1515_v35 }
  0xee   :  { %v342_v45 = vpop.f32.mrf.mxu0  ;;  %v462_v46 = vpop.f32.mrf.mxu1 }
  0xef   :  { %v1164_v47 = vpack.c.bf16 %v341_v43, %v339_v41  ;;  %v1212_v48 = vpack.c.bf16 %v461_v44, %v459_v42  ;;  %v343_v51 = vadd.f32 %v342_v45, %v1512_v34  ;;  %v463_v52 = vadd.f32 %v462_v46, %v1512_v34 }
  0xf0   :  { %v344_v30 = vpop.f32.mrf.mxu0  ;;  %v464_v50 = vpop.f32.mrf.mxu1 }
  0xf1   :  { %960 = vst [vmem:[#allocation2 + $0x48] sm:$0xff] %v1164_v47  ;;  %1008 = vst [vmem:[#allocation2 + $0x168] sm:$0xff] %v1212_v48  ;;  %v345_v53 = vadd.f32 %v344_v30, %v1515_v35  ;;  %v465_v54 = vadd.f32 %v464_v50, %v1515_v35 }
  0xf2   :  { %v348_v55 = vpop.f32.mrf.mxu0  ;;  %v1246_v56 = vpop.f32.mrf.mxu1 }
  0xf3   :  { %v1166_v57 = vpack.c.bf16 %v345_v53, %v343_v51  ;;  %v1214_v58 = vpack.c.bf16 %v465_v54, %v463_v52  ;;  %v510_v59 = vadd.f32 %v1246_v56, %v1547_v49  ;;  %v349_v61 = vadd.f32 %v348_v55, %v1512_v34 }
  0xf4   :  { %v350_v33 = vpop.f32.mrf.mxu0  ;;  %v501_v60 = vpop.f32.mrf.mxu1 }
  0xf5   :  { %962 = vst [vmem:[#allocation2 + $0x54] sm:$0xff] %v1166_v57  ;;  %1010 = vst [vmem:[#allocation2 + $0x174] sm:$0xff] %v1214_v58  ;;  %v1157_v62 = vpack.c.bf16 %v510_v59, %v510_v59  ;;  %v351_v63 = vadd.f32 %v350_v33, %v1515_v35  ;;  %v502_v0 = vadd.f32 %v501_v60, %v1547_v49 }
  0xf6   :  { %v352_v1 = vpop.f32.mrf.mxu0  ;;  %v1247_v2 = vpop.f32.mrf.mxu1 }
  0xf7   :  { %953 = vst [vmem:[#allocation2 + $0x20] sm:$0xf] %v1157_v62  ;;  %v1168_v3 = vpack.c.bf16 %v351_v63, %v349_v61  ;;  %v1153_v4 = vpack.c.bf16 %v502_v0, %v502_v0  ;;  %v513_v5 = vadd.f32 %v1247_v2, %v1547_v49  ;;  %v353_v8 = vadd.f32 %v352_v1, %v1512_v34 }
  0xf8   :  { %v354_v6 = vpop.f32.mrf.mxu0  ;;  %v504_v7 = vpop.f32.mrf.mxu1 }
  0xf9   :  { %964 = vst [vmem:[#allocation2 + $0x60] sm:$0xff] %v1168_v3  ;;  %949 = vst [vmem:[#allocation2 + $0x8] sm:$0xf] %v1153_v4  ;;  %v1159_v9 = vpack.c.bf16 %v513_v5, %v513_v5  ;;  %v355_v10 = vadd.f32 %v354_v6, %v1515_v35  ;;  %v505_v11 = vadd.f32 %v504_v7, %v1547_v49 }
  0xfa   :  { %v358_v12 = vpop.f32.mrf.mxu0  ;;  %v1250_v13 = vpop.f32.mrf.mxu1 }
  0xfb   :  { %955 = vst [vmem:[#allocation2 + $0x2c] sm:$0xf] %v1159_v9  ;;  %v1170_v14 = vpack.c.bf16 %v355_v10, %v353_v8  ;;  %v1155_v15 = vpack.c.bf16 %v505_v11, %v505_v11  ;;  %v526_v16 = vadd.f32 %v1250_v13, %v1547_v49  ;;  %v359_v19 = vadd.f32 %v358_v12, %v1512_v34 }
  0xfc   :  { %v360_v17 = vpop.f32.mrf.mxu0  ;;  %v517_v18 = vpop.f32.mrf.mxu1 }
  0xfd   :  { %966 = vst [vmem:[#allocation2 + $0x6c] sm:$0xff] %v1170_v14  ;;  %951 = vst [vmem:[#allocation2 + $0x14] sm:$0xf] %v1155_v15  ;;  %v1165_v20 = vpack.c.bf16 %v526_v16, %v526_v16  ;;  %v361_v21 = vadd.f32 %v360_v17, %v1515_v35  ;;  %v518_v22 = vadd.f32 %v517_v18, %v1547_v49 }
  0xfe   :  { %v362_v23 = vpop.f32.mrf.mxu0  ;;  %v1251_v24 = vpop.f32.mrf.mxu1 }
  0xff   :  { %961 = vst [vmem:[#allocation2 + $0x50] sm:$0xf] %v1165_v20  ;;  %v1172_v25 = vpack.c.bf16 %v361_v21, %v359_v19  ;;  %v1161_v26 = vpack.c.bf16 %v518_v22, %v518_v22  ;;  %v529_v27 = vadd.f32 %v1251_v24, %v1547_v49  ;;  %v363_v31 = vadd.f32 %v362_v23, %v1512_v34 }
 0x100   :  { %v364_v28 = vpop.f32.mrf.mxu0  ;;  %v520_v29 = vpop.f32.mrf.mxu1 }
 0x101   :  { %968 = vst [vmem:[#allocation2 + $0x78] sm:$0xff] %v1172_v25  ;;  %957 = vst [vmem:[#allocation2 + $0x38] sm:$0xf] %v1161_v26  ;;  %v1167_v32 = vpack.c.bf16 %v529_v27, %v529_v27  ;;  %v365_v36 = vadd.f32 %v364_v28, %v1515_v35  ;;  %v521_v37 = vadd.f32 %v520_v29, %v1547_v49 }
 0x102   :  { %v368_v38 = vpop.f32.mrf.mxu0  ;;  %v1254_v39 = vpop.f32.mrf.mxu1 }
 0x103   :  { %963 = vst [vmem:[#allocation2 + $0x5c] sm:$0xf] %v1167_v32  ;;  %v1174_v40 = vpack.c.bf16 %v365_v36, %v363_v31  ;;  %v1163_v41 = vpack.c.bf16 %v521_v37, %v521_v37  ;;  %v542_v42 = vadd.f32 %v1254_v39, %v1547_v49  ;;  %v369_v45 = vadd.f32 %v368_v38, %v1512_v34 }
 0x104   :  { %v370_v43 = vpop.f32.mrf.mxu0  ;;  %v533_v44 = vpop.f32.mrf.mxu1 }
 0x105   :  { %970 = vst [vmem:[#allocation2 + $0x84] sm:$0xff] %v1174_v40  ;;  %959 = vst [vmem:[#allocation2 + $0x44] sm:$0xf] %v1163_v41  ;;  %v1173_v46 = vpack.c.bf16 %v542_v42, %v542_v42  ;;  %v371_v47 = vadd.f32 %v370_v43, %v1515_v35  ;;  %v534_v48 = vadd.f32 %v533_v44, %v1547_v49 }
 0x106   :  { %v372_v30 = vpop.f32.mrf.mxu0  ;;  %v1255_v50 = vpop.f32.mrf.mxu1 }
 0x107   :  { %969 = vst [vmem:[#allocation2 + $0x80] sm:$0xf] %v1173_v46  ;;  %v1176_v51 = vpack.c.bf16 %v371_v47, %v369_v45  ;;  %v1169_v52 = vpack.c.bf16 %v534_v48, %v534_v48  ;;  %v545_v53 = vadd.f32 %v1255_v50, %v1547_v49  ;;  %v373_v56 = vadd.f32 %v372_v30, %v1512_v34 }
 0x108   :  { %v374_v54 = vpop.f32.mrf.mxu0  ;;  %v536_v55 = vpop.f32.mrf.mxu1 }
 0x109   :  { %972 = vst [vmem:[#allocation2 + $0x90] sm:$0xff] %v1176_v51  ;;  %965 = vst [vmem:[#allocation2 + $0x68] sm:$0xf] %v1169_v52  ;;  %v1175_v57 = vpack.c.bf16 %v545_v53, %v545_v53  ;;  %v375_v58 = vadd.f32 %v374_v54, %v1515_v35  ;;  %v537_v59 = vadd.f32 %v536_v55, %v1547_v49 }
 0x10a   :  { %v378_v33 = vpop.f32.mrf.mxu0  ;;  %v1258_v60 = vpop.f32.mrf.mxu1 }
 0x10b   :  { %971 = vst [vmem:[#allocation2 + $0x8c] sm:$0xf] %v1175_v57  ;;  %v1178_v61 = vpack.c.bf16 %v375_v58, %v373_v56  ;;  %v1171_v62 = vpack.c.bf16 %v537_v59, %v537_v59  ;;  %v558_v63 = vadd.f32 %v1258_v60, %v1547_v49  ;;  %v379_v2 = vadd.f32 %v378_v33, %v1512_v34 }
 0x10c   :  { %v380_v0 = vpop.f32.mrf.mxu0  ;;  %v549_v1 = vpop.f32.mrf.mxu1 }
 0x10d   :  { %974 = vst [vmem:[#allocation2 + $0x9c] sm:$0xff] %v1178_v61  ;;  %967 = vst [vmem:[#allocation2 + $0x74] sm:$0xf] %v1171_v62  ;;  %v1181_v3 = vpack.c.bf16 %v558_v63, %v558_v63  ;;  %v381_v4 = vadd.f32 %v380_v0, %v1515_v35  ;;  %v550_v5 = vadd.f32 %v549_v1, %v1547_v49 }
 0x10e   :  { %v382_v6 = vpop.f32.mrf.mxu0  ;;  %v1259_v7 = vpop.f32.mrf.mxu1 }
 0x10f   :  { %977 = vst [vmem:[#allocation2 + $0xb0] sm:$0xf] %v1181_v3  ;;  %v1180_v8 = vpack.c.bf16 %v381_v4, %v379_v2  ;;  %v1177_v9 = vpack.c.bf16 %v550_v5, %v550_v5  ;;  %v561_v10 = vadd.f32 %v1259_v7, %v1547_v49  ;;  %v383_v13 = vadd.f32 %v382_v6, %v1512_v34 }
 0x110   :  { %v384_v11 = vpop.f32.mrf.mxu0  ;;  %v552_v12 = vpop.f32.mrf.mxu1 }
 0x111   :  { %976 = vst [vmem:[#allocation2 + $0xa8] sm:$0xff] %v1180_v8  ;;  %973 = vst [vmem:[#allocation2 + $0x98] sm:$0xf] %v1177_v9  ;;  %v1183_v14 = vpack.c.bf16 %v561_v10, %v561_v10  ;;  %v385_v15 = vadd.f32 %v384_v11, %v1515_v35  ;;  %v553_v16 = vadd.f32 %v552_v12, %v1547_v49 }
 0x112   :  { %v388_v17 = vpop.f32.mrf.mxu0  ;;  %v1262_v18 = vpop.f32.mrf.mxu1 }
 0x113   :  { %979 = vst [vmem:[#allocation2 + $0xbc] sm:$0xf] %v1183_v14  ;;  %v1182_v19 = vpack.c.bf16 %v385_v15, %v383_v13  ;;  %v1179_v20 = vpack.c.bf16 %v553_v16, %v553_v16  ;;  %v574_v21 = vadd.f32 %v1262_v18, %v1547_v49  ;;  %v389_v24 = vadd.f32 %v388_v17, %v1512_v34 }
 0x114   :  { %v390_v22 = vpop.f32.mrf.mxu0  ;;  %v565_v23 = vpop.f32.mrf.mxu1 }
 0x115   :  { %978 = vst [vmem:[#allocation2 + $0xb4] sm:$0xff] %v1182_v19  ;;  %975 = vst [vmem:[#allocation2 + $0xa4] sm:$0xf] %v1179_v20  ;;  %v1189_v25 = vpack.c.bf16 %v574_v21, %v574_v21  ;;  %v391_v26 = vadd.f32 %v390_v22, %v1515_v35  ;;  %v566_v27 = vadd.f32 %v565_v23, %v1547_v49 }
 0x116   :  { %v392_v28 = vpop.f32.mrf.mxu0  ;;  %v1263_v29 = vpop.f32.mrf.mxu1 }
 0x117   :  { %985 = vst [vmem:[#allocation2 + $0xe0] sm:$0xf] %v1189_v25  ;;  %v1184_v31 = vpack.c.bf16 %v391_v26, %v389_v24  ;;  %v1185_v32 = vpack.c.bf16 %v566_v27, %v566_v27  ;;  %v577_v36 = vadd.f32 %v1263_v29, %v1547_v49  ;;  %v393_v39 = vadd.f32 %v392_v28, %v1512_v34 }
 0x118   :  { %v394_v37 = vpop.f32.mrf.mxu0  ;;  %v568_v38 = vpop.f32.mrf.mxu1 }
 0x119   :  { %980 = vst [vmem:[#allocation2 + $0xc0] sm:$0xff] %v1184_v31  ;;  %981 = vst [vmem:[#allocation2 + $0xc8] sm:$0xf] %v1185_v32  ;;  %v1191_v40 = vpack.c.bf16 %v577_v36, %v577_v36  ;;  %v395_v41 = vadd.f32 %v394_v37, %v1515_v35  ;;  %v569_v42 = vadd.f32 %v568_v38, %v1547_v49 }
 0x11a   :  { %v398_v43 = vpop.f32.mrf.mxu0  ;;  %v1266_v44 = vpop.f32.mrf.mxu1 }
 0x11b   :  { %987 = vst [vmem:[#allocation2 + $0xec] sm:$0xf] %v1191_v40  ;;  %v1186_v45 = vpack.c.bf16 %v395_v41, %v393_v39  ;;  %v1187_v46 = vpack.c.bf16 %v569_v42, %v569_v42  ;;  %v590_v47 = vadd.f32 %v1266_v44, %v1547_v49  ;;  %v399_v50 = vadd.f32 %v398_v43, %v1512_v34 }
 0x11c   :  { %v400_v48 = vpop.f32.mrf.mxu0  ;;  %v581_v30 = vpop.f32.mrf.mxu1 }
 0x11d   :  { %982 = vst [vmem:[#allocation2 + $0xcc] sm:$0xff] %v1186_v45  ;;  %983 = vst [vmem:[#allocation2 + $0xd4] sm:$0xf] %v1187_v46  ;;  %v1197_v51 = vpack.c.bf16 %v590_v47, %v590_v47  ;;  %v401_v52 = vadd.f32 %v400_v48, %v1515_v35  ;;  %v582_v53 = vadd.f32 %v581_v30, %v1547_v49 }
 0x11e   :  { %v402_v54 = vpop.f32.mrf.mxu0  ;;  %v1267_v55 = vpop.f32.mrf.mxu1 }
 0x11f   :  { %993 = vst [vmem:[#allocation2 + $0x110] sm:$0xf] %v1197_v51  ;;  %v1188_v56 = vpack.c.bf16 %v401_v52, %v399_v50  ;;  %v1193_v57 = vpack.c.bf16 %v582_v53, %v582_v53  ;;  %v593_v58 = vadd.f32 %v1267_v55, %v1547_v49  ;;  %v403_v60 = vadd.f32 %v402_v54, %v1512_v34 }
 0x120   :  { %v404_v59 = vpop.f32.mrf.mxu0  ;;  %v584_v33 = vpop.f32.mrf.mxu1 }
 0x121   :  { %984 = vst [vmem:[#allocation2 + $0xd8] sm:$0xff] %v1188_v56  ;;  %989 = vst [vmem:[#allocation2 + $0xf8] sm:$0xf] %v1193_v57  ;;  %v1199_v61 = vpack.c.bf16 %v593_v58, %v593_v58  ;;  %v405_v62 = vadd.f32 %v404_v59, %v1515_v35  ;;  %v585_v63 = vadd.f32 %v584_v33, %v1547_v49 }
 0x122   :  { %v408_v0 = vpop.f32.mrf.mxu0  ;;  %v1270_v1 = vpop.f32.mrf.mxu1 }
 0x123   :  { %995 = vst [vmem:[#allocation2 + $0x11c] sm:$0xf] %v1199_v61  ;;  %v1190_v2 = vpack.c.bf16 %v405_v62, %v403_v60  ;;  %v1195_v3 = vpack.c.bf16 %v585_v63, %v585_v63  ;;  %v606_v4 = vadd.f32 %v1270_v1, %v1547_v49  ;;  %v409_v7 = vadd.f32 %v408_v0, %v1512_v34 }
 0x124   :  { %v410_v5 = vpop.f32.mrf.mxu0  ;;  %v597_v6 = vpop.f32.mrf.mxu1 }
 0x125   :  { %986 = vst [vmem:[#allocation2 + $0xe4] sm:$0xff] %v1190_v2  ;;  %991 = vst [vmem:[#allocation2 + $0x104] sm:$0xf] %v1195_v3  ;;  %v1205_v8 = vpack.c.bf16 %v606_v4, %v606_v4  ;;  %v411_v9 = vadd.f32 %v410_v5, %v1515_v35  ;;  %v598_v10 = vadd.f32 %v597_v6, %v1547_v49 }
 0x126   :  { %v412_v11 = vpop.f32.mrf.mxu0  ;;  %v1271_v12 = vpop.f32.mrf.mxu1 }
 0x127   :  { %1001 = vst [vmem:[#allocation2 + $0x140] sm:$0xf] %v1205_v8  ;;  %v1192_v13 = vpack.c.bf16 %v411_v9, %v409_v7  ;;  %v1201_v14 = vpack.c.bf16 %v598_v10, %v598_v10  ;;  %v609_v15 = vadd.f32 %v1271_v12, %v1547_v49  ;;  %v413_v18 = vadd.f32 %v412_v11, %v1512_v34 }
 0x128   :  { %v414_v16 = vpop.f32.mrf.mxu0  ;;  %v600_v17 = vpop.f32.mrf.mxu1 }
 0x129   :  { %988 = vst [vmem:[#allocation2 + $0xf0] sm:$0xff] %v1192_v13  ;;  %997 = vst [vmem:[#allocation2 + $0x128] sm:$0xf] %v1201_v14  ;;  %v1207_v19 = vpack.c.bf16 %v609_v15, %v609_v15  ;;  %v415_v20 = vadd.f32 %v414_v16, %v1515_v35  ;;  %v601_v21 = vadd.f32 %v600_v17, %v1547_v49 }
 0x12a   :  { %v418_v22 = vpop.f32.mrf.mxu0  ;;  %v1274_v23 = vpop.f32.mrf.mxu1 }
 0x12b   :  { %1003 = vst [vmem:[#allocation2 + $0x14c] sm:$0xf] %v1207_v19  ;;  %v1194_v24 = vpack.c.bf16 %v415_v20, %v413_v18  ;;  %v1203_v25 = vpack.c.bf16 %v601_v21, %v601_v21  ;;  %v622_v26 = vadd.f32 %v1274_v23, %v1547_v49  ;;  %v419_v29 = vadd.f32 %v418_v22, %v1512_v34 }
 0x12c   :  { %v420_v27 = vpop.f32.mrf.mxu0  ;;  %v613_v28 = vpop.f32.mrf.mxu1 }
 0x12d   :  { %990 = vst [vmem:[#allocation2 + $0xfc] sm:$0xff] %v1194_v24  ;;  %999 = vst [vmem:[#allocation2 + $0x134] sm:$0xf] %v1203_v25  ;;  %v1213_v31 = vpack.c.bf16 %v622_v26, %v622_v26  ;;  %v421_v32 = vadd.f32 %v420_v27, %v1515_v35  ;;  %v614_v36 = vadd.f32 %v613_v28, %v1547_v49 }
 0x12e   :  { %v422_v37 = vpop.f32.mrf.mxu0  ;;  %v1275_v38 = vpop.f32.mrf.mxu1 }
 0x12f   :  { %1009 = vst [vmem:[#allocation2 + $0x170] sm:$0xf] %v1213_v31  ;;  %v1196_v39 = vpack.c.bf16 %v421_v32, %v419_v29  ;;  %v1209_v40 = vpack.c.bf16 %v614_v36, %v614_v36  ;;  %v625_v41 = vadd.f32 %v1275_v38, %v1547_v49  ;;  %v423_v44 = vadd.f32 %v422_v37, %v1512_v34 }
 0x130   :  { %v424_v42 = vpop.f32.mrf.mxu0  ;;  %v616_v43 = vpop.f32.mrf.mxu1 }
 0x131   :  { %992 = vst [vmem:[#allocation2 + $0x108] sm:$0xff] %v1196_v39  ;;  %1005 = vst [vmem:[#allocation2 + $0x158] sm:$0xf] %v1209_v40  ;;  %v1215_v45 = vpack.c.bf16 %v625_v41, %v625_v41  ;;  %v425_v46 = vadd.f32 %v424_v42, %v1515_v35  ;;  %v617_v47 = vadd.f32 %v616_v43, %v1547_v49 }
 0x133   :  { %1011 = vst [vmem:[#allocation2 + $0x17c] sm:$0xf] %v1215_v45  ;;  %v1198_v48 = vpack.c.bf16 %v425_v46, %v423_v44  ;;  %v1211_v30 = vpack.c.bf16 %v617_v47, %v617_v47 }
 0x135   :  { %994 = vst [vmem:[#allocation2 + $0x114] sm:$0xff] %v1198_v48  ;;  %1007 = vst [vmem:[#allocation2 + $0x164] sm:$0xf] %v1211_v30 }
 0x136   :  { %1331 = shalt.err (!%p1328_p4)
}
 0x137   :  { %s1344_s16 = smov 192   ;;  %s1345_s17 = smov 12  }
 0x138   :  { %1023 = dma.vmem_to_hbm [thread:$0]  %s1018_s14, 6144, %s1623_s3, [#allocation3], %s1344_s16, %s1344_s16, %s1345_s17  }
 0x139   :  { %1340 = dma.done.wait [#allocation3], 6144  }
 0x13a   :  { %1341 = vsyncadd [#allocation3], 4294961152 }
 0x13b   :  { %1027 = vsyncpa [#allocation3], 1 }

</bundles_post_ra>
